<compile_context>
chip_gen: v6e
topology: v6e:2x2x1
jax: 0.10.0
libtpu: 0.0.40
codegen_flags: <defaults>
</compile_context>

<pallas_src>
import jax
import jax.numpy as jnp
from jax.experimental import pallas as pl
from jax.experimental.pallas import tpu as pltpu


def _round_up(x, m):
    return ((x + m - 1) // m) * m


def _proj_kernel(x_ref, w_ref, b_ref, o_ref):
    # x_ref: (TM, K) bf16 patch rows, w_ref: (K, TE) bf16, b_ref: (1, TE) f32,
    # o_ref: (TM, TE).  MXU matmul with f32 accumulation, bias add in f32.
    acc = jnp.dot(x_ref[...], w_ref[...], preferred_element_type=jnp.float32)
    o_ref[...] = (acc + b_ref[...]).astype(o_ref.dtype)


def hybrid_embed_proj(patches, weight, bias, *, out_dtype=jnp.float32):
    """patches: (M, K), weight: (K, E), bias: (E,) f32 -> (M, E) out_dtype."""
    M, K = patches.shape
    K2, E = weight.shape
    assert K == K2

    x_bytes = patches.dtype.itemsize
    w_bytes = weight.dtype.itemsize
    out_bytes = jnp.dtype(out_dtype).itemsize

    # ---- tile selection -----------------------------------------------------
    if M >= 512:
        # Prefer 512 (MXU-friendly on v6e/v7x) but fall back to 256 when it
        # cuts zero-padding waste; both are multiples of 256/128.
        tile_m = min((512, 256), key=lambda t: _round_up(M, t))
    else:
        tile_m = _round_up(M, 8)          # single tile, sublane-aligned

    e128 = _round_up(E, 128)              # lane-dense output (no masked vst)
    tile_e = e128 if e128 <= 1024 else 512

    def vmem_need(tm, te):
        # double-buffered x / w / out blocks + bias
        return (2 * tm * K * x_bytes + 2 * K * te * w_bytes
                + 2 * tm * te * out_bytes + 2 * te * 4)

    budget = 40 * 1024 * 1024             # conservative for v7x's 64 MiB VMEM
    while vmem_need(tile_m, tile_e) > budget and tile_m > 128:
        tile_m = max(128, (tile_m // 2 // 8) * 8)
    while vmem_need(tile_m, tile_e) > budget and tile_e > 128:
        tile_e = max(128, (tile_e // 2 // 128) * 128)

    M_pad = _round_up(M, tile_m)
    E_pad = _round_up(E, tile_e)

    # ---- pad operands so the grid divides evenly ----------------------------
    patches_p = patches if M_pad == M else jnp.pad(
        patches, ((0, M_pad - M), (0, 0)))
    weight_p = weight if E_pad == E else jnp.pad(
        weight, ((0, 0), (0, E_pad - E)))
    bias_p = bias if E_pad == E else jnp.pad(bias, (0, E_pad - E))
    bias2d = bias_p.reshape(1, E_pad).astype(jnp.float32)

    grid = (M_pad // tile_m, E_pad // tile_e)

    vmem_limit = int(min(max(vmem_need(tile_m, tile_e) * 2, 16 * 1024 * 1024),
                         48 * 1024 * 1024))

    cost = pl.CostEstimate(
        flops=2 * M_pad * K * E_pad,
        transcendentals=0,
        bytes_accessed=(M_pad * K * x_bytes + K * E_pad * w_bytes
                        + E_pad * 4 + M_pad * E_pad * out_bytes))

    out = pl.pallas_call(
        _proj_kernel,
        out_shape=jax.ShapeDtypeStruct((M_pad, E_pad), out_dtype),
        grid_spec=pltpu.PrefetchScalarGridSpec(
            num_scalar_prefetch=0,
            grid=grid,
            in_specs=[
                pl.BlockSpec((tile_m, K), lambda i, j: (i, 0)),
                pl.BlockSpec((K, tile_e), lambda i, j: (0, j)),
                pl.BlockSpec((1, tile_e), lambda i, j: (0, j)),
            ],
            out_specs=pl.BlockSpec((tile_m, tile_e), lambda i, j: (i, j)),
        ),
        compiler_params=pltpu.CompilerParams(
            dimension_semantics=("parallel", "parallel"),
            vmem_limit_bytes=vmem_limit),
        cost_estimate=cost,
    )(patches_p, weight_p, bias2d)

    if M_pad != M or E_pad != E:
        out = out[:M, :E]
    return out


def hybrid_embed_forward(x_nchw, conv_w, conv_b, patch_size, *,
                         compute_dtype=jnp.bfloat16, out_dtype=jnp.float32):
    """Equivalent of HybridEmbed.forward (backbone == identity).

    x_nchw : (B, C, H, W)   feature map
    conv_w : (E, C, p, p)   nn.Conv2d weight (PyTorch OIHW layout)
    conv_b : (E,)           nn.Conv2d bias
    Returns (x_embed, (Hp, Wp)) with x_embed: (B, Hp*Wp, E).
    """
    B, C, H, W = x_nchw.shape
    p = patch_size
    assert H % p == 0 and W % p == 0
    Hp, Wp = H // p, W // p
    E = conv_w.shape[0]

    # Patchify in bf16 (halves the HBM traffic of the re-layout vs f32):
    # (B,C,H,W) -> (B, Hp*Wp, C*p*p), inner order (C, ph, pw) -- identical to
    # how a stride==kernel Conv2d consumes its OIHW weight.
    xc = x_nchw.astype(compute_dtype)
    xp = xc.reshape(B, C, Hp, p, Wp, p)
    xp = jnp.transpose(xp, (0, 2, 4, 1, 3, 5))           # (B, Hp, Wp, C, p, p)
    patches = xp.reshape(B * Hp * Wp, C * p * p)

    # Conv weight -> dense projection matrix: (E, C*p*p) -> (C*p*p, E), bf16.
    w_mat = conv_w.reshape(E, C * p * p).T.astype(compute_dtype)
    b_vec = conv_b.astype(jnp.float32)

    out = hybrid_embed_proj(patches, w_mat, b_vec, out_dtype=out_dtype)
    return out.reshape(B, Hp * Wp, E), (Hp, Wp)


if __name__ == "__main__":
    # Small shapes consistent with the module: batch=2, feature_dim=4,
    # spatial=16x16, patch_size=2, embed_dim=32  ->  num_patches = 64.
    B, C, H, W = 2, 4, 16, 16
    P = 2
    E = 32

    key = jax.random.PRNGKey(0)
    kx, kw, kb = jax.random.split(key, 3)
    x = jax.random.normal(kx, (B, C, H, W), dtype=jnp.float32)
    conv_w = jax.random.normal(kw, (E, C, P, P), dtype=jnp.float32) * 0.02
    conv_b = jax.random.normal(kb, (E,), dtype=jnp.float32) * 0.02

    out, (Hp, Wp) = hybrid_embed_forward(x, conv_w, conv_b, P)
    out = jax.block_until_ready(out)

    # Reference: same bf16 operand rounding + f32 accumulation as the kernel
    # (strided conv == nn.Conv2d(kernel_size=stride=P)), then flatten(2).T.
    ref = jax.lax.conv_general_dilated(
        x.astype(jnp.bfloat16), conv_w.astype(jnp.bfloat16),
        window_strides=(P, P), padding="VALID",
        dimension_numbers=("NCHW", "OIHW", "NCHW"),
        preferred_element_type=jnp.float32)
    ref = ref + conv_b.reshape(1, E, 1, 1)
    ref = ref.reshape(B, E, Hp * Wp).transpose(0, 2, 1)

    assert out.shape == (B, Hp * Wp, E)
    assert (Hp, Wp) == (H // P, W // P)
    assert jnp.allclose(out, ref, atol=1e-3, rtol=1e-3)

    print("KERNEL_OK")
</pallas_src>

<mosaic_0001>
module attributes {stable_mosaic.version = 11 : i64} {
  func.func @_proj_kernel(%arg0: i32, %arg1: i32, %arg2: memref<128x16xbf16, #tpu.memory_space<vmem>>, %arg3: memref<16x128xbf16, #tpu.memory_space<vmem>>, %arg4: memref<1x128xf32, #tpu.memory_space<vmem>>, %arg5: memref<128x128xf32, #tpu.memory_space<vmem>>) attributes {dimension_semantics = [#tpu.dimension_semantics<parallel>, #tpu.dimension_semantics<parallel>], iteration_bounds = array<i64: 1, 1>, scalar_prefetch = 0 : i64, scratch_operands = 0 : i64, tpu.core_type = #tpu.core_type<tc>, window_params = [{transform_indices = @transform_0, window_bounds = array<i64: 128, 16>}, {transform_indices = @transform_1, window_bounds = array<i64: 16, 128>}, {transform_indices = @transform_2, window_bounds = array<i64: 1, 128>}, {transform_indices = @transform_3, window_bounds = array<i64: 128, 128>}]} {
    %c0 = arith.constant 0 : index
    %c0_0 = arith.constant 0 : index
    %0 = vector.load %arg2[%c0, %c0_0] : memref<128x16xbf16, #tpu.memory_space<vmem>>, vector<128x16xbf16>
    %c0_1 = arith.constant 0 : index
    %c0_2 = arith.constant 0 : index
    %1 = vector.load %arg3[%c0_1, %c0_2] : memref<16x128xbf16, #tpu.memory_space<vmem>>, vector<16x128xbf16>
    %cst = arith.constant dense<0.000000e+00> : vector<128x128xf32>
    %2 = tpu.matmul %0, %1, %cst {dimension_numbers = #tpu.dot_dimension_numbers<[1], [0], [0], [1], [0, 0, 1, 1], [], []>} : vector<128x16xbf16>, vector<16x128xbf16>, vector<128x128xf32> -> vector<128x128xf32>
    %c0_3 = arith.constant 0 : index
    %c0_4 = arith.constant 0 : index
    %3 = vector.load %arg4[%c0_3, %c0_4] : memref<1x128xf32, #tpu.memory_space<vmem>>, vector<1x128xf32>
    %4 = vector.broadcast %3 : vector<1x128xf32> to vector<128x128xf32>
    %5 = arith.addf %2, %4 : vector<128x128xf32>
    %c0_5 = arith.constant 0 : index
    %c0_6 = arith.constant 0 : index
    %6 = vector.load %arg5[%c0_5, %c0_6] : memref<128x128xf32, #tpu.memory_space<vmem>>, vector<128x128xf32>
    tpu.vector_store %arg5[%c0_5, %c0_6], %5 {strides = array<i32>} : memref<128x128xf32, #tpu.memory_space<vmem>>, vector<128x128xf32>,
    return
  }
  func.func @transform_0(%arg0: i32, %arg1: i32) -> (i32, i32) {
    %c0_i32 = arith.constant 0 : i32
    %c0_i32_0 = arith.constant 0 : i32
    return %arg0, %c0_i32 : i32, i32
  }
  func.func @transform_1(%arg0: i32, %arg1: i32) -> (i32, i32) {
    %c0_i32 = arith.constant 0 : i32
    %c0_i32_0 = arith.constant 0 : i32
    return %c0_i32, %arg1 : i32, i32
  }
  func.func @transform_2(%arg0: i32, %arg1: i32) -> (i32, i32) {
    %c0_i32 = arith.constant 0 : i32
    %c0_i32_0 = arith.constant 0 : i32
    return %c0_i32, %arg1 : i32, i32
  }
  func.func @transform_3(%arg0: i32, %arg1: i32) -> (i32, i32) {
    %c0_i32 = arith.constant 0 : i32
    return %arg0, %arg1 : i32, i32
  }
}

</mosaic_0001>

<bundles_post_ra>
// kernel: tpu_custom_call.1
= control target key start
LH: loop header
LB: loop body
LE: loop exit
PB: predicated region body
PF: predicated region fallthrough
CT: control target
= control target key end

     0   :  { %vm87_vm0 = vcmask 130048   ;;  %s386_s0 = inlined_call_operand.vmem [shape: bf16[128,16], index: 0, kind: input, shape index: {}]   ;;  %s387_s1 = inlined_call_operand.vmem [shape: bf16[16,128], index: 1, kind: input, shape index: {}]   ;;  %s388_s2 = inlined_call_operand.vmem [shape: f32[1,128], index: 2, kind: input, shape index: {}]   ;;  %s389_s3 = inlined_call_operand.hbm [shape: f32[128,128], index: 3, kind: output, shape index: {}]  }
   0x1   :  { %v291_v0 = vld [vmem:[%s387_s1] sm:$0xff]   ;;  %v294_v3 = vld [vmem:[%s386_s0 + $0x8] sm:$0xff]   ;;  %v296_v5 = vld [vmem:[%s386_s0 + $0x10] sm:$0xff]  }
   0x2   :  { %v292_v1 = vld [vmem:[%s386_s0] sm:$0xff]   ;;  %268 = vmatprep.subr.bf16.mxu0 %v291_v0  ;;  %286 = vmatprep.subr.bf16.mxu1 %v291_v0  ;;  %v295_v4 = vld [vmem:[%s386_s0 + $0x28] sm:$0xff]   ;;  %v297_v6 = vld [vmem:[%s386_s0 + $0x30] sm:$0xff]  }
   0x3   :  { %v293_v2 = vld [vmem:[%s386_s0 + $0x20] sm:$0xff]   ;;  %269 = vmatpush3.bf16.msra.mxu0 %v291_v0  ;;  %287 = vmatpush3.bf16.msra.mxu1 %v291_v0 }
   0x4   :  { %270 = vmatprep.mubr.msk.bf16.mxu0 %vm87_vm0, %v292_v1  ;;  %278 = vmatprep.mubr.msk.bf16.mxu1 %vm87_vm0, %v293_v2 }
   0x6   :  { %271 = vmatmul.mubr.msk.bf16.vlgmr.msra.gmra.mxu0 %vm87_vm0, %v294_v3  ;;  %279 = vmatmul.mubr.msk.bf16.vlgmr.msra.gmra.mxu1 %vm87_vm0, %v295_v4 }
   0x7   :  { %274 = vmatprep.mubr.msk.bf16.mxu0 %vm87_vm0, %v296_v5  ;;  %282 = vmatprep.mubr.msk.bf16.mxu1 %vm87_vm0, %v297_v6 }
   0x8   :  { %8 = vsyncpa [#allocation3], 0  ;;  %v298_v7 = vld [vmem:[%s386_s0 + $0x18] sm:$0xff]   ;;  %v241_v9 = vld [vmem:[%s388_s2] ss:$0 sm:$0xff] }
   0x9   :  { %v299_v8 = vld [vmem:[%s386_s0 + $0x38] sm:$0xff]   ;;  %s322_s0 = smov [#allocation2]  }
   0xa   :  { %s230_s2 = sshll.u32 %s322_s0, 4  ;;  %s231_s2 = int_to_ptr.vmem [resolvable:$true] %s230_s2 }
   0xb   :  { %s300_s4 = scalar_lea.vmem %s231_s2, 2048  ;;  %p305_p1 = scmp.lt.s32.totalorder %s231_s2, %s231_s2 }
   0xc   :  { %p301_p0 = scmp.ne.s32.totalorder %s231_s2, %s300_s4  ;;  %p306_p2 = scmp.lt.s32.totalorder %s300_s4, %s300_s4 }
   0xe   :  { %275 = vmatmul.mubr.msk.bf16.gmra.mxu0 %vm87_vm0, %v298_v7  ;;  %283 = vmatmul.mubr.msk.bf16.gmra.mxu1 %vm87_vm0, %v299_v8  ;;  %p307_p3 = por %p306_p2, %p305_p1 }
  0x10   :  { %p308_p4 = pnand %p307_p3, %p301_p0 }
  0xc6   :  { %v272_v10 = vpop.f32.mrf.mxu0  ;;  %v280_v11 = vpop.f32.mrf.mxu1 }
  0xc7   :  { %v155_v12 = vadd.f32 %v272_v10, %v241_v9  ;;  %v187_v13 = vadd.f32 %v280_v11, %v241_v9 }
  0xc8   :  { %v146_v14 = vpop.f32.mrf.mxu0  ;;  %v178_v15 = vpop.f32.mrf.mxu1 }
  0xc9   :  { %211 = vst [vmem:[#allocation2 + $0x10] sm:$0xff] %v155_v12  ;;  %219 = vst [vmem:[#allocation2 + $0x50] sm:$0xff] %v187_v13  ;;  %v147_v16 = vadd.f32 %v241_v9, %v146_v14  ;;  %v179_v17 = vadd.f32 %v241_v9, %v178_v15 }
  0xca   :  { %v273_v18 = vpop.f32.mrf.mxu0  ;;  %v281_v19 = vpop.f32.mrf.mxu1 }
  0xcb   :  { %209 = vst [vmem:[#allocation2] sm:$0xff] %v147_v16  ;;  %217 = vst [vmem:[#allocation2 + $0x40] sm:$0xff] %v179_v17  ;;  %v158_v20 = vadd.f32 %v273_v18, %v241_v9  ;;  %v190_v21 = vadd.f32 %v281_v19, %v241_v9 }
  0xcc   :  { %v149_v22 = vpop.f32.mrf.mxu0  ;;  %v181_v23 = vpop.f32.mrf.mxu1 }
  0xcd   :  { %212 = vst [vmem:[#allocation2 + $0x18] sm:$0xff] %v158_v20  ;;  %220 = vst [vmem:[#allocation2 + $0x58] sm:$0xff] %v190_v21  ;;  %v150_v24 = vadd.f32 %v241_v9, %v149_v22  ;;  %v182_v25 = vadd.f32 %v241_v9, %v181_v23 }
  0xce   :  { %v276_v26 = vpop.f32.mrf.mxu0  ;;  %v284_v27 = vpop.f32.mrf.mxu1 }
  0xcf   :  { %210 = vst [vmem:[#allocation2 + $0x8] sm:$0xff] %v150_v24  ;;  %218 = vst [vmem:[#allocation2 + $0x48] sm:$0xff] %v182_v25  ;;  %v171_v28 = vadd.f32 %v276_v26, %v241_v9  ;;  %v203_v29 = vadd.f32 %v284_v27, %v241_v9 }
  0xd0   :  { %v162_v30 = vpop.f32.mrf.mxu0  ;;  %v194_v31 = vpop.f32.mrf.mxu1 }
  0xd1   :  { %215 = vst [vmem:[#allocation2 + $0x30] sm:$0xff] %v171_v28  ;;  %223 = vst [vmem:[#allocation2 + $0x70] sm:$0xff] %v203_v29  ;;  %v163_v32 = vadd.f32 %v241_v9, %v162_v30  ;;  %v195_v33 = vadd.f32 %v241_v9, %v194_v31 }
  0xd2   :  { %v277_v34 = vpop.f32.mrf.mxu0  ;;  %v285_v35 = vpop.f32.mrf.mxu1 }
  0xd3   :  { %213 = vst [vmem:[#allocation2 + $0x20] sm:$0xff] %v163_v32  ;;  %221 = vst [vmem:[#allocation2 + $0x60] sm:$0xff] %v195_v33  ;;  %v174_v36 = vadd.f32 %v277_v34, %v241_v9  ;;  %v206_v37 = vadd.f32 %v285_v35, %v241_v9 }
  0xd4   :  { %v165_v38 = vpop.f32.mrf.mxu0  ;;  %v197_v39 = vpop.f32.mrf.mxu1 }
  0xd5   :  { %216 = vst [vmem:[#allocation2 + $0x38] sm:$0xff] %v174_v36  ;;  %224 = vst [vmem:[#allocation2 + $0x78] sm:$0xff] %v206_v37  ;;  %v166_v40 = vadd.f32 %v241_v9, %v165_v38  ;;  %v198_v41 = vadd.f32 %v241_v9, %v197_v39 }
  0xd7   :  { %214 = vst [vmem:[#allocation2 + $0x28] sm:$0xff] %v166_v40  ;;  %222 = vst [vmem:[#allocation2 + $0x68] sm:$0xff] %v198_v41 }
  0xd8   :  { %311 = shalt.err (!%p308_p4)
}
  0xd9   :  { %s323_s5 = smov 128   ;;  %s324_s6 = smov 8  }
  0xda   :  { %236 = dma.vmem_to_hbm [thread:$0]  %s231_s2, 2048, %s389_s3, [#allocation3], %s323_s5, %s323_s5, %s324_s6  }
  0xdb   :  { %320 = dma.done.wait [#allocation3], 2048  }
  0xdc   :  { %321 = vsyncadd [#allocation3], 4294965248 }
  0xdd   :  { %240 = vsyncpa [#allocation3], 1 }

</bundles_post_ra>
